<compile_context>
chip_gen: v7x
topology: tpu7x:2x2x1
jax: 0.10.0
libtpu: 0.0.40
codegen_flags: <defaults>
</compile_context>

<pallas_src>
import functools

import jax
import jax.numpy as jnp
from jax.experimental import pallas as pl
from jax.experimental.pallas import tpu as pltpu


def _round_up(v: int, m: int) -> int:
    return ((v + m - 1) // m) * m


def _local_affine_kernel(p_ref, x_ref, o_ref):
    # p_ref: (4, 3, TN) lane-last params.
    #   p_ref[j][i, pt] = A[i, j] at point pt (j = 0..2),  p_ref[3][i, pt] = b[i].
    # x_ref / o_ref: (3, TN) laid out as [component, point].
    #
    # out[i, pt] = b[i, pt] + sum_j A[i, j, pt] * x[j, pt]
    # Unrolled 3-term FMA; x_ref[j:j+1, :] is a (1, TN) row broadcast across
    # the 3 output components (sublane broadcast, plenty of VPU slack — the
    # kernel is HBM-bound).
    acc = p_ref[3] + p_ref[0] * x_ref[0:1, :]
    acc = acc + p_ref[1] * x_ref[1:2, :]
    acc = acc + p_ref[2] * x_ref[2:3, :]
    o_ref[...] = acc.astype(o_ref.dtype)


def prepare_local_affine_params(A, b):
    """One-time conversion of module parameters to the kernel layout.

    A: (B, N, 3, 3), b: (B, N, 3, 1)
    Returns P_l: (4, 3, B*N), lane-last:
      P_l[j, i, p] = A[p//N, p%N, i, j]  for j in 0..2
      P_l[3, i, p] = b[p//N, p%N, i, 0]
    Runs outside the per-call hot path.  No tile-dependent padding, so tile_n
    can be re-tuned per call / per device generation without re-running this.
    """
    B, N = A.shape[:2]
    BN = B * N
    A_l = jnp.transpose(A, (3, 2, 0, 1)).reshape(3, 3, BN)        # [j, i, p]
    b_l = jnp.transpose(b[..., 0], (2, 0, 1)).reshape(1, 3, BN)    # [_, i, p]
    return jnp.concatenate([A_l, b_l], axis=0)                      # (4, 3, BN)


def _pick_tile_and_vmem(bn: int):
    """Generation-aware tile size + scoped-VMEM limit.

    Double-buffered working set (f32, 8-sublane padding):
      params (4,3,TN) -> 128*TN B, x (3,TN) -> 32*TN B, out (3,TN) -> 32*TN B
      => 192*TN per set, 384*TN double-buffered.
    """
    try:
        kind = jax.devices()[0].device_kind.lower()
    except Exception:  # e.g. interpret mode / no device info
        kind = ""
    if ("v5 lite" in kind) or ("v5e" in kind) or ("v5litepod" in kind):
        target = 32768            # ~12.6 MiB double-buffered
    else:
        target = 65536            # ~24 MiB double-buffered (v6e / v7x / default)
    tile_n = max(128, min(target, _round_up(bn, 128)))   # lane-aligned
    vmem_limit_bytes = 384 * tile_n + (16 << 20)          # + compiler headroom
    return tile_n, vmem_limit_bytes


def local_affine_forward(P_l, x, *, tile_n=None, vmem_limit_bytes=None):
    """
    P_l: (4, 3, B*N)  (from prepare_local_affine_params)
    x:   (B, N, 3)
    returns out: (B, N, 3)
    """
    B, N, _ = x.shape
    BN = B * N
    assert P_l.shape == (4, 3, BN)

    if tile_n is None:
        tile_n, auto_vmem = _pick_tile_and_vmem(BN)
        if vmem_limit_bytes is None:
            vmem_limit_bytes = auto_vmem
    if vmem_limit_bytes is None:
        vmem_limit_bytes = 384 * tile_n + (16 << 20)

    # Per-call layout glue for the activation only (parameters pre-laid-out).
    x_l = jnp.transpose(x, (2, 0, 1)).reshape(3, BN)

    grid = (pl.cdiv(BN, tile_n),)   # ragged last block handled by Pallas masking

    out_l = pl.pallas_call(
        _local_affine_kernel,
        out_shape=jax.ShapeDtypeStruct((3, BN), x.dtype),
        grid_spec=pltpu.PrefetchScalarGridSpec(
            num_scalar_prefetch=0,
            grid=grid,
            in_specs=[
                pl.BlockSpec((4, 3, tile_n), lambda i: (0, 0, i)),
                pl.BlockSpec((3, tile_n), lambda i: (0, i)),
            ],
            out_specs=pl.BlockSpec((3, tile_n), lambda i: (0, i)),
        ),
        compiler_params=pltpu.CompilerParams(
            dimension_semantics=("parallel",),
            vmem_limit_bytes=int(vmem_limit_bytes),
        ),
    )(P_l, x_l)

    return jnp.transpose(out_l.reshape(3, B, N), (1, 2, 0))   # (B, N, 3)


if __name__ == "__main__":
    key = jax.random.PRNGKey(0)
    B, N = 2, 256

    # Module __init__: A = identity per point, b = zeros. Add a small
    # deterministic perturbation so the matvec path is actually exercised.
    k1, k2, k3 = jax.random.split(key, 3)
    A = (jnp.broadcast_to(jnp.eye(3, dtype=jnp.float32), (B, N, 3, 3))
         + 0.05 * jax.random.normal(k1, (B, N, 3, 3), dtype=jnp.float32))
    b = 0.05 * jax.random.normal(k2, (B, N, 3, 1), dtype=jnp.float32)
    x = jax.random.normal(k3, (B, N, 3), dtype=jnp.float32)

    # One-time parameter layout conversion (outside the hot path).
    P_l = prepare_local_affine_params(A, b)

    fwd = jax.jit(local_affine_forward)
    out = jax.block_until_ready(fwd(P_l, x))

    # Pure-JAX reference of the PyTorch forward.
    ref = jnp.einsum('bnij,bnj->bni', A, x) + b[..., 0]

    assert out.shape == (B, N, 3)
    assert jnp.allclose(out, ref, atol=1e-5, rtol=1e-5)
    print("KERNEL_OK")
</pallas_src>

<mosaic_0001>
module attributes {stable_mosaic.version = 11 : i64} {
  func.func @_local_affine_kernel(%arg0: i32, %arg1: memref<4x3x512xf32, #tpu.memory_space<vmem>>, %arg2: memref<3x512xf32, #tpu.memory_space<vmem>>, %arg3: memref<3x512xf32, #tpu.memory_space<vmem>>) attributes {dimension_semantics = [#tpu.dimension_semantics<parallel>], iteration_bounds = array<i64: 1>, scalar_prefetch = 0 : i64, scratch_operands = 0 : i64, tpu.core_type = #tpu.core_type<tc>, window_params = [{transform_indices = @transform_0, window_bounds = array<i64: 4, 3, 512>}, {transform_indices = @transform_1, window_bounds = array<i64: 3, 512>}, {transform_indices = @transform_2, window_bounds = array<i64: 3, 512>}]} {
    %c3 = arith.constant 3 : index
    %c0 = arith.constant 0 : index
    %c0_0 = arith.constant 0 : index
    %0 = vector.load %arg1[%c3, %c0, %c0_0] : memref<4x3x512xf32, #tpu.memory_space<vmem>>, vector<1x3x512xf32>
    %1 = vector.shape_cast %0 : vector<1x3x512xf32> to vector<3x512xf32>
    %c0_1 = arith.constant 0 : index
    %c0_2 = arith.constant 0 : index
    %c0_3 = arith.constant 0 : index
    %2 = vector.load %arg1[%c0_1, %c0_2, %c0_3] : memref<4x3x512xf32, #tpu.memory_space<vmem>>, vector<1x3x512xf32>
    %3 = vector.shape_cast %2 : vector<1x3x512xf32> to vector<3x512xf32>
    %c0_4 = arith.constant 0 : index
    %c0_5 = arith.constant 0 : index
    %4 = vector.load %arg2[%c0_4, %c0_5] : memref<3x512xf32, #tpu.memory_space<vmem>>, vector<1x512xf32>
    %5 = vector.broadcast %4 : vector<1x512xf32> to vector<3x512xf32>
    %6 = arith.mulf %3, %5 : vector<3x512xf32>
    %7 = arith.addf %1, %6 : vector<3x512xf32>
    %c1 = arith.constant 1 : index
    %c0_6 = arith.constant 0 : index
    %c0_7 = arith.constant 0 : index
    %8 = vector.load %arg1[%c1, %c0_6, %c0_7] : memref<4x3x512xf32, #tpu.memory_space<vmem>>, vector<1x3x512xf32>
    %9 = vector.shape_cast %8 : vector<1x3x512xf32> to vector<3x512xf32>
    %c1_8 = arith.constant 1 : index
    %c0_9 = arith.constant 0 : index
    %10 = vector.load %arg2[%c1_8, %c0_9] : memref<3x512xf32, #tpu.memory_space<vmem>>, vector<1x512xf32>
    %11 = vector.broadcast %10 : vector<1x512xf32> to vector<3x512xf32>
    %12 = arith.mulf %9, %11 : vector<3x512xf32>
    %13 = arith.addf %7, %12 : vector<3x512xf32>
    %c2 = arith.constant 2 : index
    %c0_10 = arith.constant 0 : index
    %c0_11 = arith.constant 0 : index
    %14 = vector.load %arg1[%c2, %c0_10, %c0_11] : memref<4x3x512xf32, #tpu.memory_space<vmem>>, vector<1x3x512xf32>
    %15 = vector.shape_cast %14 : vector<1x3x512xf32> to vector<3x512xf32>
    %c2_12 = arith.constant 2 : index
    %c0_13 = arith.constant 0 : index
    %16 = vector.load %arg2[%c2_12, %c0_13] : memref<3x512xf32, #tpu.memory_space<vmem>>, vector<1x512xf32>
    %17 = vector.broadcast %16 : vector<1x512xf32> to vector<3x512xf32>
    %18 = arith.mulf %15, %17 : vector<3x512xf32>
    %19 = arith.addf %13, %18 : vector<3x512xf32>
    %c0_14 = arith.constant 0 : index
    %c0_15 = arith.constant 0 : index
    %20 = vector.load %arg3[%c0_14, %c0_15] : memref<3x512xf32, #tpu.memory_space<vmem>>, vector<3x512xf32>
    tpu.vector_store %arg3[%c0_14, %c0_15], %19 {strides = array<i32>} : memref<3x512xf32, #tpu.memory_space<vmem>>, vector<3x512xf32>,
    return
  }
  func.func @transform_0(%arg0: i32) -> (i32, i32, i32) {
    %c0_i32 = arith.constant 0 : i32
    %c0_i32_0 = arith.constant 0 : i32
    %c0_i32_1 = arith.constant 0 : i32
    return %c0_i32, %c0_i32_0, %arg0 : i32, i32, i32
  }
  func.func @transform_1(%arg0: i32) -> (i32, i32) {
    %c0_i32 = arith.constant 0 : i32
    %c0_i32_0 = arith.constant 0 : i32
    return %c0_i32, %arg0 : i32, i32
  }
  func.func @transform_2(%arg0: i32) -> (i32, i32) {
    %c0_i32 = arith.constant 0 : i32
    %c0_i32_0 = arith.constant 0 : i32
    return %c0_i32, %arg0 : i32, i32
  }
}

</mosaic_0001>

<bundles_post_ra>
// kernel: local_affine_forward.1
= control target key start
LH: loop header
LB: loop body
LE: loop exit
PB: predicated region body
PF: predicated region fallthrough
CT: control target
= control target key end

     0   :  { %v18_v0 = vlaneseq  ;;  %s170_s1 = inlined_call_operand.vmem [shape: f32[3,512], index: 1, kind: input, shape index: {}]   ;;  %s171_s0 = inlined_call_operand.vmem [shape: f32[4,3,512], index: 0, kind: input, shape index: {}]   ;;  %s172_s2 = inlined_call_operand.vmem [shape: f32[3,512], index: 2, kind: output, shape index: {}]  }
   0x1   :  { %v16_v2 = vld [vmem:[%s170_s1] ss:$4 sm:$0xf]  ;;  %v112_v3 = vld [vmem:[%s170_s1 + $0x1] ss:$4 sm:$0xf] }
   0x2   :  { %v19_v1 = vshrl.u32 %v18_v0, 7  ;;  %v115_v6 = vld [vmem:[%s170_s1 + $0x2] ss:$4 sm:$0xf]  ;;  %v110_v14 = vld [vmem:[%s171_s0 + $0x10] sm:$0x77] }
   0x3   :  { %v14_v13 = vld [vmem:[%s171_s0] sm:$0x77]  ;;  %v15_v21 = vld [vmem:[%s171_s0 + $0x8] sm:$0x77]  ;;  %v108_v24 = vld [vmem:[%s171_s0 + $0x30] sm:$0x77] }
   0x4   :  { %v20_v4 = vsub.s32 0, %v19_v1  ;;  %v24_v5 = vsub.s32 1, %v19_v1  ;;  %v28_v7 = vsub.s32 2, %v19_v1  ;;  %v32_v8 = vsub.s32 3, %v19_v1  ;;  %v113_v25 = vld [vmem:[%s171_s0 + $0x20] sm:$0x77] }
   0x5   :  { %v111_v28 = vld [vmem:[%s171_s0 + $0x18] sm:$0x77]  ;;  %v114_v35 = vld [vmem:[%s171_s0 + $0x28] sm:$0x77] }
   0x6   :  { %v21_v9 = vrot.slane %v16_v2, %v20_v4  ;;  %v25_v10 = vrot.slane %v16_v2, %v24_v5  ;;  %v51_v11 = vrot.slane %v112_v3, %v20_v4  ;;  %v55_v12 = vrot.slane %v112_v3, %v24_v5  ;;  %v109_v33 = vld [vmem:[%s171_s0 + $0x38] sm:$0x77] }
   0x7   :  { %v81_v15 = vrot.slane %v115_v6, %v20_v4  ;;  %v85_v16 = vrot.slane %v115_v6, %v24_v5  ;;  %v29_v17 = vrot.slane %v16_v2, %v28_v7  ;;  %v33_v18 = vrot.slane %v16_v2, %v32_v8 }
   0x8   :  { %v34_v19 = vcombine.low %v21_v9, %v25_v10  ;;  %v64_v20 = vcombine.low %v51_v11, %v55_v12  ;;  %v59_v22 = vrot.slane %v112_v3, %v28_v7  ;;  %v63_v23 = vrot.slane %v112_v3, %v32_v8 }
   0x9   :  { %v94_v26 = vcombine.low %v81_v15, %v85_v16  ;;  %v35_v27 = vcombine.low %v29_v17, %v33_v18  ;;  %v89_v29 = vrot.slane %v115_v6, %v28_v7  ;;  %v93_v30 = vrot.slane %v115_v6, %v32_v8 }
   0xa   :  { %v38_v31 = vmul.f32 %v34_v19, %v14_v13  ;;  %v68_v32 = vmul.f32 %v110_v14, %v64_v20  ;;  %v65_v34 = vcombine.low %v59_v22, %v63_v23 }
   0xb   :  { %v39_v36 = vmul.f32 %v35_v27, %v15_v21  ;;  %v95_v37 = vcombine.low %v89_v29, %v93_v30  ;;  %v98_v39 = vmul.f32 %v113_v25, %v94_v26 }
   0xc   :  { %v40_v38 = vadd.f32 %v108_v24, %v38_v31  ;;  %v69_v40 = vmul.f32 %v111_v28, %v65_v34 }
   0xd   :  { %v41_v41 = vadd.f32 %v109_v33, %v39_v36  ;;  %v99_v42 = vmul.f32 %v114_v35, %v95_v37 }
   0xe   :  { %v70_v43 = vadd.f32 %v68_v32, %v40_v38 }
   0xf   :  { %v71_v44 = vadd.f32 %v69_v40, %v41_v41 }
  0x10   :  { %v100_v45 = vadd.f32 %v98_v39, %v70_v43 }
  0x11   :  { %v101_v46 = vadd.f32 %v99_v42, %v71_v44 }
  0x12   :  { %102 = vst [vmem:[%s172_s2] sm:$0x77] %v100_v45 }
  0x13   :  { %103 = vst [vmem:[%s172_s2 + $0x8] sm:$0x77] %v101_v46 }

</bundles_post_ra>
